<compile_context>
chip_gen: v6e
topology: v6e:2x2x1
jax: 0.10.0
libtpu: 0.0.40
codegen_flags: <defaults>
</compile_context>

<pallas_src>
import jax
import jax.numpy as jnp
from jax.experimental import pallas as pl
from jax.experimental.pallas import tpu as pltpu

SELU_ALPHA = 1.6732632423543772
SELU_SCALE = 1.0507009873554805
BN_EPS = 1e-5
HEAD_BLOCK_K = 2048          # K tile for the fc1 matmul (multiple of 128)


def _round_up(n, m):
    return ((n + m - 1) // m) * m


def head_k_layout(f1, block_k=HEAD_BLOCK_K):
    """Return (K tile, padded K) so every fc1 K tile is full and lane-aligned."""
    tk = min(block_k, _round_up(f1, 128))
    return tk, _round_up(f1, tk)


def _selu(x):
    # matches torch.nn.SELU; exp() is clamped so the dead branch can't overflow
    return SELU_SCALE * jnp.where(
        x > 0, x, SELU_ALPHA * (jnp.exp(jnp.minimum(x, 0.0)) - 1.0))


# ---------------------------------------------------------------------------
# Kernel 1: getAttenF pooling + fc0 + sigmoid + attention-weighted layer sum
#           + eval-mode BatchNorm2d(1) + SELU + T-direction 3-max-pool.
#           grid = (batch tiles [parallel], SSL layers [arbitrary reduction]).
# ---------------------------------------------------------------------------
def fuse_kernel(ff_ref, w0_ref, scal_ref, out_ref, acc_ref):
    l = pl.program_id(1)
    last = pl.num_programs(1) - 1

    ff = ff_ref[0].astype(jnp.float32)                  # (T, Bt, C)

    # adaptive_avg_pool1d(., 1) over time               -> (Bt, C)
    pool = jnp.mean(ff, axis=0)
    # fc0 = Linear(C, 1) as a lane-reduce (no N=1 MXU matmul), then sigmoid
    logits = jnp.sum(pool * w0_ref[...], axis=-1, keepdims=True) + scal_ref[0]
    y0 = jax.nn.sigmoid(logits)                          # (Bt, 1)

    @pl.when(l == 0)
    def _():
        acc_ref[...] = jnp.zeros_like(acc_ref)

    # attention-weighted running sum over the SSL-layer axis
    acc_ref[...] += ff * y0[None, :, :]

    @pl.when(l == last)
    def _():
        # eval-mode BatchNorm2d(1) folded into scale/shift, then SELU
        fused = _selu(acc_ref[...] * scal_ref[1] + scal_ref[2])   # (T, Bt, C)
        # T-direction half of the 3x3 max-pool: elementwise max of 3
        # consecutive time slabs (no lane/sublane crossing).
        tp = out_ref.shape[0]
        pooled = jnp.max(
            fused[:tp * 3].reshape(tp, 3, fused.shape[1], fused.shape[2]),
            axis=1)
        out_ref[...] = pooled.astype(out_ref.dtype)


def fuse_call(layer_feats, w0, b0, bn_scale, bn_shift):
    """layer_feats: (L, T, B, C) -- native stack of per-layer (T, B, C) outputs."""
    L, T, B, C = layer_feats.shape
    Tp = T // 3
    Bt = 8 if B % 8 == 0 else B            # batch tile (parallel / megacore axis)
    nb = B // Bt
    scalars = jnp.stack([
        jnp.asarray(b0, jnp.float32).reshape(()),
        jnp.asarray(bn_scale, jnp.float32).reshape(()),
        jnp.asarray(bn_shift, jnp.float32).reshape(()),
    ])
    return pl.pallas_call(
        fuse_kernel,
        out_shape=jax.ShapeDtypeStruct((Tp, B, C), layer_feats.dtype),
        grid=(nb, L),
        in_specs=[
            pl.BlockSpec((1, T, Bt, C), lambda bb, l: (l, 0, bb, 0)),
            pl.BlockSpec((1, C), lambda bb, l: (0, 0)),
            pl.BlockSpec(memory_space=pltpu.MemorySpace.SMEM),
        ],
        out_specs=pl.BlockSpec((Tp, Bt, C), lambda bb, l: (0, bb, 0)),
        scratch_shapes=[pltpu.VMEM((T, Bt, C), jnp.float32)],
        compiler_params=pltpu.CompilerParams(
            dimension_semantics=("parallel", "arbitrary"),
            vmem_limit_bytes=48 * 1024 * 1024),
    )(layer_feats, w0, scalars)


# ---------------------------------------------------------------------------
# Kernel 2: classifier head.  fc1 is K-tiled (reduction grid axis, streamed
#           bf16 weights, f32 accumulator); fc3 -> SELU -> LogSoftmax epilogue.
# ---------------------------------------------------------------------------
def head_kernel(x_ref, w1_ref, b1_ref, w3_ref, b3_ref, out_ref, acc_ref):
    k = pl.program_id(0)

    @pl.when(k == 0)
    def _():
        acc_ref[...] = jnp.zeros_like(acc_ref)

    # fc1 partial product for this K tile (bf16 x bf16 -> f32 on the MXU)
    acc_ref[...] += jnp.dot(x_ref[...], w1_ref[...],
                            preferred_element_type=jnp.float32)

    @pl.when(k == pl.num_programs(0) - 1)
    def _():
        h = _selu(acc_ref[...] + b1_ref[...])                         # (B, H)
        z = _selu(jnp.dot(h, w3_ref[...],
                          preferred_element_type=jnp.float32) + b3_ref[...])
        m = jnp.max(z, axis=1, keepdims=True)
        lse = m + jnp.log(jnp.sum(jnp.exp(z - m), axis=1, keepdims=True))
        out_ref[...] = z - lse                                        # log-softmax


def head_call(x, w1, b1, w3, b3):
    """x: (B, Kp) zero-padded features; w1: (Kp, H) zero-padded fc1 weight."""
    B, Kp = x.shape
    H = w1.shape[1]
    tk = min(HEAD_BLOCK_K, Kp)
    assert Kp % tk == 0
    nk = Kp // tk
    return pl.pallas_call(
        head_kernel,
        out_shape=jax.ShapeDtypeStruct((B, 2), jnp.float32),
        grid=(nk,),
        in_specs=[
            pl.BlockSpec((B, tk), lambda k: (0, k)),
            pl.BlockSpec((tk, H), lambda k: (k, 0)),
            pl.BlockSpec((1, H), lambda k: (0, 0)),
            pl.BlockSpec((H, 2), lambda k: (0, 0)),
            pl.BlockSpec((1, 2), lambda k: (0, 0)),
        ],
        out_specs=pl.BlockSpec((B, 2), lambda k: (0, 0)),
        scratch_shapes=[pltpu.VMEM((B, H), jnp.float32)],
        compiler_params=pltpu.CompilerParams(
            dimension_semantics=("arbitrary",),
            vmem_limit_bytes=48 * 1024 * 1024),
    )(x, w1, b1, w3, b3)


# ---------------------------------------------------------------------------
# Glue (plain JAX, all on small 1/3- or 1/9-sized tensors): C-direction part
# of the 3x3 max-pool, layout fix, flatten, K zero-padding.
# ---------------------------------------------------------------------------
def model_forward(layer_feats, params):
    L, T, B, C = layer_feats.shape
    Tp, Cp = T // 3, C // 3

    fused = fuse_call(layer_feats, params["w0"], params["b0"],
                      params["bn_scale"], params["bn_shift"])    # (Tp, B, C)

    # lane-direction (C) half of the 3x3 max-pool on the already T-pooled slab
    pooled = jnp.max(fused[:, :, :Cp * 3].reshape(Tp, B, Cp, 3), axis=-1)
    flat = jnp.transpose(pooled, (1, 0, 2)).reshape(B, Tp * Cp)  # (B, F1)

    # zero-pad K so every head K tile is full and lane-aligned
    Kp = params["w1"].shape[0]
    flat = jnp.pad(flat, ((0, 0), (0, Kp - flat.shape[1])))

    return head_call(flat, params["w1"], params["b1"],
                     params["w3"], params["b3"])                 # (B, 2)


# ---------------------------------------------------------------------------
# Pure-JAX reference of the PyTorch forward (for correctness checking).
# ---------------------------------------------------------------------------
def reference_forward(layer_feats, params):
    ff = jnp.transpose(layer_feats.astype(jnp.float32), (2, 0, 1, 3))  # (B,L,T,C)
    pool = jnp.mean(ff, axis=2)                                        # (B,L,C)
    y0 = jax.nn.sigmoid(
        jnp.sum(pool * params["w0"], axis=-1, keepdims=True) + params["b0"])
    fused = jnp.sum(ff * y0[:, :, :, None], axis=1)                    # (B,T,C)
    x = _selu(fused * params["bn_scale"] + params["bn_shift"])
    B, T, C = x.shape
    Tp, Cp = T // 3, C // 3
    x = jnp.max(x[:, :Tp * 3, :Cp * 3].reshape(B, Tp, 3, Cp, 3), axis=(2, 4))
    flat = x.reshape(B, Tp * Cp)
    w1 = params["w1"].astype(jnp.float32)[:Tp * Cp]
    h = _selu(flat @ w1 + params["b1"])
    z = _selu(h @ params["w3"] + params["b3"])
    return jax.nn.log_softmax(z, axis=1)


def init_params(key, C, F1, H):
    ks = jax.random.split(key, 6)
    w0 = jax.random.normal(ks[0], (1, C), jnp.float32) * 0.05      # fc0 weight
    b0 = jax.random.normal(ks[1], (), jnp.float32) * 0.05          # fc0 bias
    # eval-mode BatchNorm2d(1): fold (gamma, beta, running_mean, running_var)
    gamma, beta = jnp.float32(0.9), jnp.float32(0.1)
    rmean, rvar = jnp.float32(0.05), jnp.float32(1.2)
    bn_scale = gamma / jnp.sqrt(rvar + BN_EPS)
    bn_shift = beta - rmean * bn_scale
    # fc1 weight, pre-padded once (rows >= F1 are zero) to the K-tiled layout
    _, kp = head_k_layout(F1)
    w1 = jnp.zeros((kp, H), jnp.float32)
    w1 = w1.at[:F1].set(jax.random.normal(ks[2], (F1, H), jnp.float32) * 0.05)
    w1 = w1.astype(jnp.bfloat16)
    b1 = jax.random.normal(ks[3], (1, H), jnp.float32) * 0.05
    w3 = jax.random.normal(ks[4], (H, 2), jnp.float32) * 0.05
    b3 = jax.random.normal(ks[5], (1, 2), jnp.float32) * 0.05
    return dict(w0=w0, b0=b0, bn_scale=bn_scale, bn_shift=bn_shift,
                w1=w1, b1=b1, w3=w3, b3=b3)


if __name__ == "__main__":
    # Small analogs of the real model: L=24 -> 4, T=201 -> 12, C=1024 -> 32,
    # fc1 in-features 22847 -> (12//3)*(32//3)=40, hidden 1024 -> 16.
    B, L, T, C, H = 2, 4, 12, 32, 16
    Tp, Cp = T // 3, C // 3
    F1 = Tp * Cp

    key = jax.random.PRNGKey(0)
    k_x, k_p = jax.random.split(key)
    # SSL per-layer outputs layer[0] (T, B, C), stacked natively to (L, T, B, C)
    # and kept as the bf16 hot stream (no XLA transpose of the big tensor).
    layer_feats = jax.random.normal(
        k_x, (L, T, B, C), jnp.float32).astype(jnp.bfloat16)
    params = init_params(k_p, C, F1, H)

    fwd = jax.jit(model_forward)
    out = jax.block_until_ready(fwd(layer_feats, params))

    assert out.shape == (B, 2)
    # log-softmax rows must exponentiate-sum to 1
    assert jnp.allclose(jnp.sum(jnp.exp(out), axis=1), 1.0, atol=1e-4)
    # match the pure-JAX reference (bf16 stream tolerance)
    ref = reference_forward(layer_feats, params)
    assert jnp.allclose(out, ref, atol=5e-2), (out, ref)
    print("KERNEL_OK")
</pallas_src>

<mosaic_0001>
module attributes {stable_mosaic.version = 11 : i64} {
  func.func @fuse_kernel(%arg0: i32, %arg1: i32, %arg2: memref<1x12x2x32xbf16, #tpu.memory_space<vmem>>, %arg3: memref<1x32xf32, #tpu.memory_space<vmem>>, %arg4: memref<3xf32, #tpu.memory_space<smem>>, %arg5: memref<4x2x32xbf16, #tpu.memory_space<vmem>>, %arg6: memref<12x2x32xf32, #tpu.memory_space<vmem>>) attributes {dimension_semantics = [#tpu.dimension_semantics<parallel>, #tpu.dimension_semantics<arbitrary>], iteration_bounds = array<i64: 1, 4>, scalar_prefetch = 0 : i64, scratch_operands = 1 : i64, tpu.core_type = #tpu.core_type<tc>, window_params = [{transform_indices = @transform_0, window_bounds = array<i64: 1, 12, 2, 32>}, {pipeline_mode = #tpu.pipeline_mode<synchronous>, transform_indices = @transform_1, window_bounds = array<i64: 1, 32>}, {transform_indices = @transform_2, window_bounds = array<i64: 3>}, {transform_indices = @transform_3, window_bounds = array<i64: 4, 2, 32>}]} {
    %c0 = arith.constant 0 : index
    %c0_0 = arith.constant 0 : index
    %c0_1 = arith.constant 0 : index
    %c0_2 = arith.constant 0 : index
    %0 = vector.load %arg2[%c0, %c0_0, %c0_1, %c0_2] : memref<1x12x2x32xbf16, #tpu.memory_space<vmem>>, vector<1x12x2x32xbf16>
    %1 = vector.shape_cast %0 : vector<1x12x2x32xbf16> to vector<12x2x32xbf16>
    %2 = arith.extf %1 : vector<12x2x32xbf16> to vector<12x2x32xf32>
    %cst = arith.constant dense<0.000000e+00> : vector<2x32xf32>
    %3 = vector.multi_reduction <add>, %2, %cst [0] : vector<12x2x32xf32> to vector<2x32xf32>
    %cst_3 = arith.constant 1.200000e+01 : f32
    %4 = vector.broadcast %cst_3 : f32 to vector<2x32xf32>
    %5 = arith.divf %3, %4 : vector<2x32xf32>
    %c0_4 = arith.constant 0 : index
    %c0_5 = arith.constant 0 : index
    %6 = vector.load %arg3[%c0_4, %c0_5] : memref<1x32xf32, #tpu.memory_space<vmem>>, vector<1x32xf32>
    %7 = vector.broadcast %6 : vector<1x32xf32> to vector<2x32xf32>
    %8 = arith.mulf %5, %7 : vector<2x32xf32>
    %cst_6 = arith.constant dense<0.000000e+00> : vector<2xf32>
    %9 = vector.multi_reduction <add>, %8, %cst_6 [1] : vector<2x32xf32> to vector<2xf32>
    %10 = vector.shape_cast %9 : vector<2xf32> to vector<2x1xf32>
    %c0_7 = arith.constant 0 : index
    %11 = memref.load %arg4[%c0_7] : memref<3xf32, #tpu.memory_space<smem>>
    %12 = vector.broadcast %11 : f32 to vector<2x1xf32>
    %13 = arith.addf %10, %12 : vector<2x1xf32>
    %14 = arith.negf %13 : vector<2x1xf32>
    %15 = math.exp %14 : vector<2x1xf32>
    %cst_8 = arith.constant 1.000000e+00 : f32
    %16 = vector.broadcast %cst_8 : f32 to vector<2x1xf32>
    %17 = arith.addf %16, %15 : vector<2x1xf32>
    %18 = arith.divf %16, %17 : vector<2x1xf32>
    %c0_i32 = arith.constant 0 : i32
    %19 = arith.cmpi eq, %arg1, %c0_i32 : i32
    %20 = arith.extui %19 : i1 to i32
    %c0_i32_9 = arith.constant 0 : i32
    %21 = arith.cmpi ne, %20, %c0_i32_9 : i32
    scf.if %21 {
      %cst_17 = arith.constant 0.000000e+00 : f32
      %31 = vector.broadcast %cst_17 : f32 to vector<12x2x32xf32>
      %c0_18 = arith.constant 0 : index
      %c0_19 = arith.constant 0 : index
      %c0_20 = arith.constant 0 : index
      %32 = vector.load %arg6[%c0_18, %c0_19, %c0_20] : memref<12x2x32xf32, #tpu.memory_space<vmem>>, vector<12x2x32xf32>
      tpu.vector_store %arg6[%c0_18, %c0_19, %c0_20], %31 {strides = array<i32>} : memref<12x2x32xf32, #tpu.memory_space<vmem>>, vector<12x2x32xf32>,
    } else {
    }
    %c0_10 = arith.constant 0 : index
    %c0_11 = arith.constant 0 : index
    %c0_12 = arith.constant 0 : index
    %22 = vector.load %arg6[%c0_10, %c0_11, %c0_12] : memref<12x2x32xf32, #tpu.memory_space<vmem>>, vector<12x2x32xf32>
    %23 = vector.shape_cast %18 : vector<2x1xf32> to vector<1x2x1xf32>
    %24 = vector.broadcast %23 : vector<1x2x1xf32> to vector<12x2x32xf32>
    %25 = arith.mulf %2, %24 : vector<12x2x32xf32>
    %26 = arith.addf %22, %25 : vector<12x2x32xf32>
    %c0_13 = arith.constant 0 : index
    %c0_14 = arith.constant 0 : index
    %c0_15 = arith.constant 0 : index
    %27 = vector.load %arg6[%c0_13, %c0_14, %c0_15] : memref<12x2x32xf32, #tpu.memory_space<vmem>>, vector<12x2x32xf32>
    tpu.vector_store %arg6[%c0_13, %c0_14, %c0_15], %26 {strides = array<i32>} : memref<12x2x32xf32, #tpu.memory_space<vmem>>, vector<12x2x32xf32>,
    %c3_i32 = arith.constant 3 : i32
    %28 = arith.cmpi eq, %arg1, %c3_i32 : i32
    %29 = arith.extui %28 : i1 to i32
    %c0_i32_16 = arith.constant 0 : i32
    %30 = arith.cmpi ne, %29, %c0_i32_16 : i32
    scf.if %30 {
      %c0_17 = arith.constant 0 : index
      %c0_18 = arith.constant 0 : index
      %c0_19 = arith.constant 0 : index
      %31 = vector.load %arg6[%c0_17, %c0_18, %c0_19] : memref<12x2x32xf32, #tpu.memory_space<vmem>>, vector<12x2x32xf32>
      %c1 = arith.constant 1 : index
      %32 = memref.load %arg4[%c1] : memref<3xf32, #tpu.memory_space<smem>>
      %33 = vector.broadcast %32 : f32 to vector<12x2x32xf32>
      %34 = arith.mulf %31, %33 : vector<12x2x32xf32>
      %c2 = arith.constant 2 : index
      %35 = memref.load %arg4[%c2] : memref<3xf32, #tpu.memory_space<smem>>
      %36 = vector.broadcast %35 : f32 to vector<12x2x32xf32>
      %37 = arith.addf %34, %36 : vector<12x2x32xf32>
      %cst_20 = arith.constant 0.000000e+00 : f32
      %38 = vector.broadcast %cst_20 : f32 to vector<12x2x32xf32>
      %39 = arith.cmpf ogt, %37, %38 : vector<12x2x32xf32>
      %cst_21 = arith.constant 0.000000e+00 : f32
      %40 = vector.broadcast %cst_21 : f32 to vector<12x2x32xf32>
      %41 = arith.minimumf %37, %40 : vector<12x2x32xf32>
      %42 = math.exp %41 : vector<12x2x32xf32>
      %cst_22 = arith.constant 1.000000e+00 : f32
      %43 = vector.broadcast %cst_22 : f32 to vector<12x2x32xf32>
      %44 = arith.subf %42, %43 : vector<12x2x32xf32>
      %cst_23 = arith.constant 1.67326319 : f32
      %45 = vector.broadcast %cst_23 : f32 to vector<12x2x32xf32>
      %46 = arith.mulf %45, %44 : vector<12x2x32xf32>
      %47 = arith.select %39, %37, %46 : vector<12x2x32xi1>, vector<12x2x32xf32>
      %cst_24 = arith.constant 1.05070102 : f32
      %48 = vector.broadcast %cst_24 : f32 to vector<12x2x32xf32>
      %49 = arith.mulf %48, %47 : vector<12x2x32xf32>
      %50 = vector.shape_cast %49 : vector<12x2x32xf32> to vector<4x3x2x32xf32>
      %cst_25 = arith.constant dense<0xFF800000> : vector<4x2x32xf32>
      %51 = vector.multi_reduction <maximumf>, %50, %cst_25 [1] : vector<4x3x2x32xf32> to vector<4x2x32xf32>
      %52 = arith.truncf %51 : vector<4x2x32xf32> to vector<4x2x32xbf16>
      %c0_26 = arith.constant 0 : index
      %c0_27 = arith.constant 0 : index
      %c0_28 = arith.constant 0 : index
      %53 = vector.load %arg5[%c0_26, %c0_27, %c0_28] : memref<4x2x32xbf16, #tpu.memory_space<vmem>>, vector<4x2x32xbf16>
      tpu.vector_store %arg5[%c0_26, %c0_27, %c0_28], %52 {strides = array<i32>} : memref<4x2x32xbf16, #tpu.memory_space<vmem>>, vector<4x2x32xbf16>,
    } else {
    }
    return
  }
  func.func @transform_0(%arg0: i32, %arg1: i32) -> (i32, i32, i32, i32) {
    %c0_i32 = arith.constant 0 : i32
    %c0_i32_0 = arith.constant 0 : i32
    %c0_i32_1 = arith.constant 0 : i32
    return %arg1, %c0_i32, %arg0, %c0_i32_0 : i32, i32, i32, i32
  }
  func.func @transform_1(%arg0: i32, %arg1: i32) -> (i32, i32) {
    %c0_i32 = arith.constant 0 : i32
    %c0_i32_0 = arith.constant 0 : i32
    %c0_i32_1 = arith.constant 0 : i32
    return %c0_i32, %c0_i32_0 : i32, i32
  }
  func.func @transform_2(%arg0: i32, %arg1: i32) -> i32 {
    %c0_i32 = arith.constant 0 : i32
    %c0_i32_0 = arith.constant 0 : i32
    return %c0_i32 : i32
  }
  func.func @transform_3(%arg0: i32, %arg1: i32) -> (i32, i32, i32) {
    %c0_i32 = arith.constant 0 : i32
    %c0_i32_0 = arith.constant 0 : i32
    %c0_i32_1 = arith.constant 0 : i32
    return %c0_i32, %arg0, %c0_i32_0 : i32, i32, i32
  }
}

module attributes {stable_mosaic.version = 11 : i64} {
  func.func @head_kernel(%arg0: i32, %arg1: memref<2x128xbf16, #tpu.memory_space<vmem>>, %arg2: memref<128x16xbf16, #tpu.memory_space<vmem>>, %arg3: memref<1x16xf32, #tpu.memory_space<vmem>>, %arg4: memref<16x2xf32, #tpu.memory_space<vmem>>, %arg5: memref<1x2xf32, #tpu.memory_space<vmem>>, %arg6: memref<2x2xf32, #tpu.memory_space<vmem>>, %arg7: memref<2x16xf32, #tpu.memory_space<vmem>>) attributes {dimension_semantics = [#tpu.dimension_semantics<arbitrary>], iteration_bounds = array<i64: 1>, scalar_prefetch = 0 : i64, scratch_operands = 1 : i64, tpu.core_type = #tpu.core_type<tc>, window_params = [{transform_indices = @transform_0, window_bounds = array<i64: 2, 128>}, {transform_indices = @transform_1, window_bounds = array<i64: 128, 16>}, {pipeline_mode = #tpu.pipeline_mode<synchronous>, transform_indices = @transform_2, window_bounds = array<i64: 1, 16>}, {pipeline_mode = #tpu.pipeline_mode<synchronous>, transform_indices = @transform_3, window_bounds = array<i64: 16, 2>}, {pipeline_mode = #tpu.pipeline_mode<synchronous>, transform_indices = @transform_4, window_bounds = array<i64: 1, 2>}, {pipeline_mode = #tpu.pipeline_mode<synchronous>, transform_indices = @transform_5, window_bounds = array<i64: 2, 2>}]} {
    %c0_i32 = arith.constant 0 : i32
    %0 = arith.cmpi eq, %arg0, %c0_i32 : i32
    %1 = arith.extui %0 : i1 to i32
    %c0_i32_0 = arith.constant 0 : i32
    %2 = arith.cmpi ne, %1, %c0_i32_0 : i32
    scf.if %2 {
      %cst_10 = arith.constant 0.000000e+00 : f32
      %12 = vector.broadcast %cst_10 : f32 to vector<2x16xf32>
      %c0_11 = arith.constant 0 : index
      %c0_12 = arith.constant 0 : index
      %13 = vector.load %arg7[%c0_11, %c0_12] : memref<2x16xf32, #tpu.memory_space<vmem>>, vector<2x16xf32>
      tpu.vector_store %arg7[%c0_11, %c0_12], %12 {strides = array<i32>} : memref<2x16xf32, #tpu.memory_space<vmem>>, vector<2x16xf32>,
    } else {
    }
    %c0 = arith.constant 0 : index
    %c0_1 = arith.constant 0 : index
    %3 = vector.load %arg7[%c0, %c0_1] : memref<2x16xf32, #tpu.memory_space<vmem>>, vector<2x16xf32>
    %c0_2 = arith.constant 0 : index
    %c0_3 = arith.constant 0 : index
    %4 = vector.load %arg1[%c0_2, %c0_3] : memref<2x128xbf16, #tpu.memory_space<vmem>>, vector<2x128xbf16>
    %c0_4 = arith.constant 0 : index
    %c0_5 = arith.constant 0 : index
    %5 = vector.load %arg2[%c0_4, %c0_5] : memref<128x16xbf16, #tpu.memory_space<vmem>>, vector<128x16xbf16>
    %cst = arith.constant dense<0.000000e+00> : vector<2x16xf32>
    %6 = tpu.matmul %4, %5, %cst {dimension_numbers = #tpu.dot_dimension_numbers<[1], [0], [0], [1], [0, 0, 1, 1], [], []>} : vector<2x128xbf16>, vector<128x16xbf16>, vector<2x16xf32> -> vector<2x16xf32>
    %7 = arith.addf %3, %6 : vector<2x16xf32>
    %c0_6 = arith.constant 0 : index
    %c0_7 = arith.constant 0 : index
    %8 = vector.load %arg7[%c0_6, %c0_7] : memref<2x16xf32, #tpu.memory_space<vmem>>, vector<2x16xf32>
    tpu.vector_store %arg7[%c0_6, %c0_7], %7 {strides = array<i32>} : memref<2x16xf32, #tpu.memory_space<vmem>>, vector<2x16xf32>,
    %c0_i32_8 = arith.constant 0 : i32
    %9 = arith.cmpi eq, %arg0, %c0_i32_8 : i32
    %10 = arith.extui %9 : i1 to i32
    %c0_i32_9 = arith.constant 0 : i32
    %11 = arith.cmpi ne, %10, %c0_i32_9 : i32
    scf.if %11 {
      %c0_10 = arith.constant 0 : index
      %c0_11 = arith.constant 0 : index
      %12 = vector.load %arg7[%c0_10, %c0_11] : memref<2x16xf32, #tpu.memory_space<vmem>>, vector<2x16xf32>
      %c0_12 = arith.constant 0 : index
      %c0_13 = arith.constant 0 : index
      %13 = vector.load %arg3[%c0_12, %c0_13] : memref<1x16xf32, #tpu.memory_space<vmem>>, vector<1x16xf32>
      %14 = vector.broadcast %13 : vector<1x16xf32> to vector<2x16xf32>
      %15 = arith.addf %12, %14 : vector<2x16xf32>
      %cst_14 = arith.constant 0.000000e+00 : f32
      %16 = vector.broadcast %cst_14 : f32 to vector<2x16xf32>
      %17 = arith.cmpf ogt, %15, %16 : vector<2x16xf32>
      %cst_15 = arith.constant 0.000000e+00 : f32
      %18 = vector.broadcast %cst_15 : f32 to vector<2x16xf32>
      %19 = arith.minimumf %15, %18 : vector<2x16xf32>
      %20 = math.exp %19 : vector<2x16xf32>
      %cst_16 = arith.constant 1.000000e+00 : f32
      %21 = vector.broadcast %cst_16 : f32 to vector<2x16xf32>
      %22 = arith.subf %20, %21 : vector<2x16xf32>
      %cst_17 = arith.constant 1.67326319 : f32
      %23 = vector.broadcast %cst_17 : f32 to vector<2x16xf32>
      %24 = arith.mulf %23, %22 : vector<2x16xf32>
      %25 = arith.select %17, %15, %24 : vector<2x16xi1>, vector<2x16xf32>
      %cst_18 = arith.constant 1.05070102 : f32
      %26 = vector.broadcast %cst_18 : f32 to vector<2x16xf32>
      %27 = arith.mulf %26, %25 : vector<2x16xf32>
      %c0_19 = arith.constant 0 : index
      %c0_20 = arith.constant 0 : index
      %28 = vector.load %arg4[%c0_19, %c0_20] : memref<16x2xf32, #tpu.memory_space<vmem>>, vector<16x2xf32>
      %cst_21 = arith.constant dense<0.000000e+00> : vector<2x2xf32>
      %29 = tpu.matmul %27, %28, %cst_21 {dimension_numbers = #tpu.dot_dimension_numbers<[1], [0], [0], [1], [0, 0, 1, 1], [], []>} : vector<2x16xf32>, vector<16x2xf32>, vector<2x2xf32> -> vector<2x2xf32>
      %c0_22 = arith.constant 0 : index
      %c0_23 = arith.constant 0 : index
      %30 = vector.load %arg5[%c0_22, %c0_23] : memref<1x2xf32, #tpu.memory_space<vmem>>, vector<1x2xf32>
      %31 = vector.broadcast %30 : vector<1x2xf32> to vector<2x2xf32>
      %32 = arith.addf %29, %31 : vector<2x2xf32>
      %cst_24 = arith.constant 0.000000e+00 : f32
      %33 = vector.broadcast %cst_24 : f32 to vector<2x2xf32>
      %34 = arith.cmpf ogt, %32, %33 : vector<2x2xf32>
      %cst_25 = arith.constant 0.000000e+00 : f32
      %35 = vector.broadcast %cst_25 : f32 to vector<2x2xf32>
      %36 = arith.minimumf %32, %35 : vector<2x2xf32>
      %37 = math.exp %36 : vector<2x2xf32>
      %cst_26 = arith.constant 1.000000e+00 : f32
      %38 = vector.broadcast %cst_26 : f32 to vector<2x2xf32>
      %39 = arith.subf %37, %38 : vector<2x2xf32>
      %cst_27 = arith.constant 1.67326319 : f32
      %40 = vector.broadcast %cst_27 : f32 to vector<2x2xf32>
      %41 = arith.mulf %40, %39 : vector<2x2xf32>
      %42 = arith.select %34, %32, %41 : vector<2x2xi1>, vector<2x2xf32>
      %cst_28 = arith.constant 1.05070102 : f32
      %43 = vector.broadcast %cst_28 : f32 to vector<2x2xf32>
      %44 = arith.mulf %43, %42 : vector<2x2xf32>
      %cst_29 = arith.constant dense<0xFF800000> : vector<2xf32>
      %45 = vector.multi_reduction <maximumf>, %44, %cst_29 [1] : vector<2x2xf32> to vector<2xf32>
      %46 = vector.shape_cast %45 : vector<2xf32> to vector<2x1xf32>
      %47 = vector.broadcast %46 : vector<2x1xf32> to vector<2x2xf32>
      %48 = arith.subf %44, %47 : vector<2x2xf32>
      %49 = math.exp %48 : vector<2x2xf32>
      %cst_30 = arith.constant dense<0.000000e+00> : vector<2xf32>
      %50 = vector.multi_reduction <add>, %49, %cst_30 [1] : vector<2x2xf32> to vector<2xf32>
      %51 = vector.shape_cast %50 : vector<2xf32> to vector<2x1xf32>
      %52 = math.log %51 : vector<2x1xf32>
      %53 = arith.addf %46, %52 : vector<2x1xf32>
      %54 = vector.broadcast %53 : vector<2x1xf32> to vector<2x2xf32>
      %55 = arith.subf %44, %54 : vector<2x2xf32>
      %c0_31 = arith.constant 0 : index
      %c0_32 = arith.constant 0 : index
      %56 = vector.load %arg6[%c0_31, %c0_32] : memref<2x2xf32, #tpu.memory_space<vmem>>, vector<2x2xf32>
      tpu.vector_store %arg6[%c0_31, %c0_32], %55 {strides = array<i32>} : memref<2x2xf32, #tpu.memory_space<vmem>>, vector<2x2xf32>,
    } else {
    }
    return
  }
  func.func @transform_0(%arg0: i32) -> (i32, i32) {
    %c0_i32 = arith.constant 0 : i32
    %c0_i32_0 = arith.constant 0 : i32
    return %c0_i32, %arg0 : i32, i32
  }
  func.func @transform_1(%arg0: i32) -> (i32, i32) {
    %c0_i32 = arith.constant 0 : i32
    %c0_i32_0 = arith.constant 0 : i32
    return %arg0, %c0_i32 : i32, i32
  }
  func.func @transform_2(%arg0: i32) -> (i32, i32) {
    %c0_i32 = arith.constant 0 : i32
    %c0_i32_0 = arith.constant 0 : i32
    %c0_i32_1 = arith.constant 0 : i32
    return %c0_i32, %c0_i32_0 : i32, i32
  }
  func.func @transform_3(%arg0: i32) -> (i32, i32) {
    %c0_i32 = arith.constant 0 : i32
    %c0_i32_0 = arith.constant 0 : i32
    %c0_i32_1 = arith.constant 0 : i32
    return %c0_i32, %c0_i32_0 : i32, i32
  }
  func.func @transform_4(%arg0: i32) -> (i32, i32) {
    %c0_i32 = arith.constant 0 : i32
    %c0_i32_0 = arith.constant 0 : i32
    %c0_i32_1 = arith.constant 0 : i32
    return %c0_i32, %c0_i32_0 : i32, i32
  }
  func.func @transform_5(%arg0: i32) -> (i32, i32) {
    %c0_i32 = arith.constant 0 : i32
    %c0_i32_0 = arith.constant 0 : i32
    %c0_i32_1 = arith.constant 0 : i32
    return %c0_i32, %c0_i32_0 : i32, i32
  }
}

</mosaic_0001>

<bundles_post_ra>
// kernel: model_forward.2
= control target key start
LH: loop header
LB: loop body
LE: loop exit
PB: predicated region body
PF: predicated region fallthrough
CT: control target
= control target key end

     0   :  { %8 = vsyncpa [#allocation4], 0  ;;  %s1215_s0 = inlined_call_operand.hbm [shape: bf16[4,12,2,32], index: 0, kind: input, shape index: {}]   ;;  %s1216_s1 = inlined_call_operand.vmem [shape: f32[1,32], index: 1, kind: input, shape index: {}]   ;;  %s1217_s2 = inlined_call_operand.vmem [shape: f32[3], index: 2, kind: input, shape index: {}]   ;;  %s1218_s3 = inlined_call_operand.vmem [shape: bf16[4,2,32], index: 3, kind: output, shape index: {}]  }
   0x1   :  { %10 = vsyncpa [#allocation4 + $0x1], 0 }
   0x2   :  { %11 = vsyncpa [#allocation5], 0  ;;  %s849_s12 = smov 0   ;;  %s851_s13 = smov 0  }
   0x3   :  { %s853_s14 = smov 0   ;;  %s855_s15 = smov 0  }
   0x4   :  { %s857_s16 = smov 0   ;;  %s859_s17 = smov 0  }
   0x5 LB: > { %s597_s18 = sadd.s32 4294967295, %s822_s17   ;;  %s38_s19 = sadd.s32 1, %s810_s14  ;;  %s822_s17 = sphi %s859_s17, %s17_s17   ;;  %s818_s16 = sphi %s857_s16, %s1232_s16   ;;  %s814_s15 = sphi %s855_s15, %s1231_s15   ;;  %s810_s14 = sphi %s853_s14, %s1230_s14   ;;  %s806_s13 = sphi %s851_s13, %s1229_s13   ;;  %s802_s12 = sphi %s849_s12, %s1228_s12  }
   0x6   : > { %p45_p0 = scmp.ne.s32.totalorder %s810_s14, %s806_s13  ;;  %p46_p1 = scmp.eq.s32.totalorder %s822_s17, 0 }
   0x7   : > { %p51_p2 = scmp.ne.s32.totalorder %s806_s13, %s802_s12  ;;  %p883_p3 = scmp.eq.s32.totalorder %s597_s18, 0 }
   0x8   : > { %p47_p4 = por %p46_p1, %p45_p0  ;;  %p598_p5 = scmp.ge.s32.totalorder %s822_s17, 1 }
   0x9   : > { %p890_p6 = por %p883_p3, %p51_p2  ;;  %p130_p7 = scmp.lt.s32.totalorder %s822_s17, 5 }
   0xa   : > { %s146_s24 = sshll.u32 %s1217_s2, 4  ;;  %p643_p10 = scmp.lt.s32.totalorder %s822_s17, 4  ;;  %s147_s24 = int_to_ptr.vmem [resolvable:$true] %s146_s24 }
   0xb   : > { %s1222_s21 = scalar_select %p890_p6, 1, 0 }
   0xc   : > { %p898_p8 = pnand %p598_p5, %p130_p7  ;;  %s157_s26 = sand.u32 1, %s810_s14  }
   0xd   : > { %p908_p12 = pnand %p643_p10, %p47_p4  ;;  %s725_s28 = scalar_lea.vmem %s147_s24, 16 }
   0xe   : > { %s1223_s25 = scalar_select %p898_p8, 1, 0 }
   0xf   : > { %p634_p9 = pneg %p898_p8  ;;  %p726_p13 = scmp.ne.s32.totalorder %s147_s24, %s725_s28 }
  0x10   : > { %p733_p5 = scmp.lt.s32.totalorder %s147_s24, %s147_s24  ;;  %p734_p7 = scmp.lt.s32.totalorder %s725_s28, %s725_s28 }
  0x11   : > { %p635_p11 = pnand %p634_p9, %p883_p3 }
  0x12   : > { %p735_p6 = por %p734_p7, %p733_p5 }
  0x13   : > { %p727_p0 = pneg %p635_p11 }
  0x15   : > { %p728_p1 = pnand %p727_p0, %p726_p13 }
  0x17   : > { %p729_p2 = pneg %p728_p1 }
  0x19   : > { %p736_p8 = pnand %p735_p6, %p729_p2 }
  0x1b   : > { %739 = shalt.err (!%p736_p8)
}
  0x1c   : > { %s824_s29 = smov [#allocation6]   ;;  %s26_s30 = sadd.s32 1, %s818_s16 }
  0x1d   : > { %637 = dma.vmem_to_smem (!%p635_p11), %s147_s24, 16, %s824_s29, [#allocation5]  }
  0x1e   : > { %s625_s4 = smul.u32 12, %s157_s26  ;;  %p27_p4 = scmp.ge.s32.totalorder %s26_s30, 4 }
  0x1f   : > { %s626_s5 = smul.u32 192, %s818_s16  ;;  %s158_s18 = scalar_lea.sflag [#allocation4], %s157_s26 }
  0x20   : > { %s1234_s30 = smov (%p27_p4, %s26_s30), 0  ;;  %s161_s9 = scalar_lea.vmem [#allocation3], %s625_s4 }
  0x21   : > { %s168_s8 = scalar_lea.hbm %s1215_s0, %s626_s5  ;;  %s169_s10 = sshll.u32 %s161_s9, 4  ;;  %s170_s10 = int_to_ptr.vmem [resolvable:$true] %s169_s10 }
  0x22   : > { %s33_s11 = ssub.s32 %s818_s16, %s1234_s30  ;;  %p742_p8 = pneg %p908_p12 }
  0x23   : > { %p921_p6 = scmp.eq.s32.totalorder %s33_s11, 0  ;;  %s753_s22 = scalar_lea.vmem %s170_s10, 192 }
  0x24   : > { %p754_p9 = scmp.ne.s32.totalorder %s170_s10, %s753_s22  ;;  %s825_s23 = smov [#allocation3]  }
  0x25   : > { %s758_s24 = sshll.u32 %s825_s23, 4  ;;  %s759_s24 = int_to_ptr.vmem [resolvable:$false] %s758_s24 }
  0x26   : > { %p756_p10 = pnand %p754_p9, %p742_p8  ;;  %s760_s28 = scalar_lea.vmem %s759_s24, 384 }
  0x27   : > { %p761_p13 = scmp.lt.s32.totalorder %s170_s10, %s759_s24  ;;  %p762_p0 = scmp.lt.s32.totalorder %s760_s28, %s753_s22 }
  0x28   : > { %p757_p11 = pneg %p756_p10 }
  0x29   : > { %p763_p1 = por %p762_p0, %p761_p13 }
  0x2b   : > { %p764_p2 = pnand %p763_p1, %p757_p11 }
  0x2d   : > { %767 = shalt.err (!%p764_p2)
}
  0x2e   : > { %s826_s29 = smov 16   ;;  %s827_s26 = smov 1  }
  0x2f   : > { %641 = dma.hbm_to_vmem [thread:$0]  (!%p908_p12), %s168_s8, 192, %s170_s10, %s158_s18, %s826_s29, %s826_s29, %s827_s26  }
  0x30   : > { %s934_s4 = scalar_select %p921_p6, %s810_s14, %s38_s19  }
  0x31   : > { %p1226_p5 = scmp.ne.s32.totalorder %s1223_s25, 0 }
  0x32   : > { %s183_s5 = sand.u32 (!%p1226_p5), 1, %s806_s13   ;;  %p1227_p7 = scmp.ne.s32.totalorder (!%p1226_p5), %s1222_s21, 0 }
  0x33   : > { %181 = sbr.rel (%p1226_p5) target bundleno = 335 (0x14f), region = 32  ;;  %s184_s7 = scalar_lea.sflag (!%p1226_p5), [#allocation4], %s183_s5 }
  0x34   : > { %s627_s6 = smul.u32 (!%p1226_p5), 12, %s183_s5 }
  0x36   : > { %s939_s9 = scalar_lea.vmem (!%p1226_p5), [#allocation3], %s627_s6 }
  0x38   : > { %793 = dma.done.wait (%p1227_p7), %s184_s7, 192  }
  0x39   : > { %795 = vsyncadd (%p1227_p7), %s184_s7, 4294967104 }
  0x3a   : > { %797 = dma.done.wait (%p883_p3), [#allocation5], 16  }
  0x3b   : > { %799 = vsyncadd (%p883_p3), [#allocation5], 4294967280 }
  0x3c   : > { %196 = sfence }
  0x3d   : > { %v950_v0 = vld [vmem:[%s939_s9] sm:$0x1]  ;;  %v953_v1 = vld [vmem:[%s939_s9 + $0x1] sm:$0x1]  ;;  %v956_v2 = vld [vmem:[%s939_s9 + $0x2] sm:$0x1] }
  0x3e   : > { %v959_v3 = vld [vmem:[%s939_s9 + $0x3] sm:$0x1]  ;;  %v228_v4 = vunpack.c.l.bf16 %v950_v0  ;;  %v229_v5 = vunpack.c.l.bf16 %v953_v1  ;;  %v230_v6 = vunpack.c.l.bf16 %v956_v2  ;;  %v965_v7 = vld [vmem:[%s939_s9 + $0x4] sm:$0x1]  ;;  %v969_v9 = vld [vmem:[%s939_s9 + $0x5] sm:$0x1] }
  0x3f   : > { %v231_v8 = vunpack.c.l.bf16 %v959_v3  ;;  %vm240_vm0 = vcmask 254976   ;;  %v232_v10 = vunpack.c.l.bf16 %v965_v7  ;;  %v982_v14 = vld [vmem:[%s939_s9 + $0x6] sm:$0x1]  ;;  %v233_v16 = vunpack.c.l.bf16 %v969_v9  ;;  %v989_v18 = vld [vmem:[%s939_s9 + $0x7] sm:$0x1]  ;;  %s277_s21 = sld [smem:[#allocation6]] }
  0x40   : > { %v241_v11 = vsel %vm240_vm0, %v228_v4, 0.0  ;;  %v242_v12 = vsel %vm240_vm0, %v229_v5, 0.0  ;;  %v244_v13 = vsel %vm240_vm0, %v230_v6, 0.0  ;;  %v234_v20 = vunpack.c.l.bf16 %v982_v14  ;;  %v996_v22 = vld [vmem:[%s939_s9 + $0x8] sm:$0x1]  ;;  %p606_p3 = scmp.ne.s32.totalorder %s814_s15, 0 }
  0x41   : > { %v243_v15 = vadd.f32 %v242_v12, %v241_v11  ;;  %v246_v17 = vsel %vm240_vm0, %v231_v8, 0.0  ;;  %v248_v21 = vsel %vm240_vm0, %v232_v10, 0.0  ;;  %v235_v24 = vunpack.c.l.bf16 %v989_v18  ;;  %v1003_v26 = vld [vmem:[%s939_s9 + $0x9] sm:$0x1]  ;;  %v1010_v30 = vld [vmem:[%s939_s9 + $0xa] sm:$0x1] }
  0x42   : > { %v250_v25 = vsel %vm240_vm0, %v233_v16, 0.0  ;;  %v236_v28 = vunpack.c.l.bf16 %v996_v22  ;;  %v252_v29 = vsel %vm240_vm0, %v234_v20, 0.0  ;;  %v237_v32 = vunpack.c.l.bf16 %v1003_v26  ;;  %v1017_v34 = vld [vmem:[%s939_s9 + $0xb] sm:$0x1]  ;;  %v604_v47 = vld [vmem:[%s1216_s1] ss:$0 sm:$0xff] }
  0x43   : > { %v245_v19 = vadd.f32 %v244_v13, %v243_v15  ;;  %v254_v33 = vsel %vm240_vm0, %v235_v24, 0.0  ;;  %v238_v36 = vunpack.c.l.bf16 %v1010_v30  ;;  %v239_v39 = vunpack.c.l.bf16 %v1017_v34 }
  0x44   : > { %v256_v37 = vsel %vm240_vm0, %v236_v28, 0.0  ;;  %v258_v40 = vsel %vm240_vm0, %v237_v32, 0.0 }
  0x45   : > { %v247_v23 = vadd.f32 %v246_v17, %v245_v19  ;;  %v260_v42 = vsel %vm240_vm0, %v238_v36, 0.0  ;;  %v262_v44 = vsel %vm240_vm0, %v239_v39, 0.0  ;;  %v278_v51 = vstv %s277_s21 }
  0x47   : > { %v249_v27 = vadd.f32 %v248_v21, %v247_v23 }
  0x49   : > { %v251_v31 = vadd.f32 %v250_v25, %v249_v27 }
  0x4b   : > { %v253_v35 = vadd.f32 %v252_v29, %v251_v31 }
  0x4d   : > { %v255_v38 = vadd.f32 %v254_v33, %v253_v35 }
  0x4f   : > { %v257_v41 = vadd.f32 %v256_v37, %v255_v38 }
  0x51   : > { %v259_v43 = vadd.f32 %v258_v40, %v257_v41 }
  0x53   : > { %v261_v45 = vadd.f32 %v260_v42, %v259_v43 }
  0x55   : > { %v263_v46 = vadd.f32 %v262_v44, %v261_v45 }
  0x57   : > { %v265_v48 = vmul.f32 0.083333336, %v263_v46 }
  0x59   : > { %v273_v49 = vmul.f32 %v604_v47, %v265_v48 }
  0x5b   : > { %v274_v50 = vsel %vm240_vm0, %v273_v49, 0.0 }
  0x5c   : > { %275 = vadd.xlane.f32.xlu0 %v274_v50 }
  0xe5   : > { %v276_v52 = vpop.xlane.xlu0 %275 }
  0xe6   : > { %v279_v53 = vadd.f32 %v278_v51, %v276_v52 }
  0xe8   : > { %v605_v54 = vmul.f32 -1.442695, %v279_v53 }
  0xea   : > { %697 = vpow2.f32 %v605_v54 }
  0xf7   : > { %v698_v55 = vpop.eup %697 }
  0xf8   : > { %v283_v56 = vadd.f32 1.0, %v698_v55 }
  0xfa   : > { %699 = vrcp.f32 %v283_v56 }
 0x103   : > { %289 = sbr.rel (%p606_p3) target bundleno = 271 (0x10f), region = 44 }
 0x107   : > { %v700_v57 = vpop.eup %699 }
 0x108   : > { %v828_v58 = vmov 0.0  }
 0x109   : > { %290 = vst.msk [vmem:[#allocation2] sm:$0x3] %vm240_vm0, %v828_v58  ;;  %291 = vst.msk [vmem:[#allocation2 + $0x2] sm:$0x3] %vm240_vm0, %v828_v58 }
 0x10a   : > { %292 = vst.msk [vmem:[#allocation2 + $0x4] sm:$0x3] %vm240_vm0, %v828_v58  ;;  %293 = vst.msk [vmem:[#allocation2 + $0x6] sm:$0x3] %vm240_vm0, %v828_v58 }
 0x10b   : > { %294 = vst.msk [vmem:[#allocation2 + $0x8] sm:$0x3] %vm240_vm0, %v828_v58  ;;  %295 = vst.msk [vmem:[#allocation2 + $0xa] sm:$0x3] %vm240_vm0, %v828_v58 }
 0x10c   : > { %296 = vst.msk [vmem:[#allocation2 + $0xc] sm:$0x3] %vm240_vm0, %v828_v58  ;;  %297 = vst.msk [vmem:[#allocation2 + $0xe] sm:$0x3] %vm240_vm0, %v828_v58 }
 0x10d   : > { %298 = vst.msk [vmem:[#allocation2 + $0x10] sm:$0x3] %vm240_vm0, %v828_v58  ;;  %299 = vst.msk [vmem:[#allocation2 + $0x12] sm:$0x3] %vm240_vm0, %v828_v58 }
 0x10e   : > { %300 = vst.msk [vmem:[#allocation2 + $0x14] sm:$0x3] %vm240_vm0, %v828_v58  ;;  %301 = vst.msk [vmem:[#allocation2 + $0x16] sm:$0x3] %vm240_vm0, %v828_v58 }
 0x10f PF: > { %v314_v60 = vmul.f32 %v700_v57, %v228_v4  ;;  %v315_v62 = vmul.f32 %v700_v57, %v229_v5  ;;  %v316_v11 = vmul.f32 %v700_v57, %v230_v6  ;;  %v317_v12 = vmul.f32 %v700_v57, %v231_v8  ;;  %p607_p12 = scmp.ne.s32.totalorder %s814_s15, 3 }
 0x110   : > { %v302_v59 = vld [vmem:[#allocation2] sm:$0x3]  ;;  %v303_v61 = vld [vmem:[#allocation2 + $0x2] sm:$0x3]  ;;  %v318_v17 = vmul.f32 %v700_v57, %v232_v10  ;;  %v319_v0 = vmul.f32 %v700_v57, %v233_v16  ;;  %v320_v1 = vmul.f32 %v700_v57, %v234_v20  ;;  %v321_v4 = vmul.f32 %v700_v57, %v235_v24  ;;  %s608_s25 = sld [smem:[#allocation6 + $0x1]] (!%p607_p12) }
 0x111   : > { %v304_v63 = vld [vmem:[#allocation2 + $0x4] sm:$0x3]  ;;  %v305_v13 = vld [vmem:[#allocation2 + $0x6] sm:$0x3]  ;;  %v326_v2 = vadd.f32 %v314_v60, %v302_v59  ;;  %v327_v5 = vadd.f32 %v315_v62, %v303_v61  ;;  %v322_v14 = vmul.f32 %v700_v57, %v236_v28  ;;  %v323_v18 = vmul.f32 %v700_v57, %v237_v32  ;;  %s609_s27 = sld [smem:[#allocation6 + $0x2]] (!%p607_p12) }
 0x112   : > { %v306_v15 = vld [vmem:[#allocation2 + $0x8] sm:$0x3]  ;;  %v307_v19 = vld [vmem:[#allocation2 + $0xa] sm:$0x3]  ;;  %v328_v6 = vadd.f32 %v316_v11, %v304_v63  ;;  %v329_v3 = vadd.f32 %v317_v12, %v305_v13  ;;  %v324_v20 = vmul.f32 %v700_v57, %v238_v36  ;;  %v325_v24 = vmul.f32 %v700_v57, %v239_v39 }
 0x113   : > { %v308_v8 = vld [vmem:[#allocation2 + $0xc] sm:$0x3]  ;;  %v309_v21 = vld [vmem:[#allocation2 + $0xe] sm:$0x3]  ;;  %v330_v25 = vadd.f32 %v318_v17, %v306_v15  ;;  %v331_v7 = vadd.f32 %v319_v0, %v307_v19  ;;  %338 = vst.msk [vmem:[#allocation2] sm:$0x3] %vm240_vm0, %v326_v2 }
 0x114   : > { %v310_v23 = vld [vmem:[#allocation2 + $0x10] sm:$0x3]  ;;  %v332_v10 = vadd.f32 %v320_v1, %v308_v8  ;;  %v333_v27 = vadd.f32 %v321_v4, %v309_v21  ;;  %v311_v29 = vld [vmem:[#allocation2 + $0x12] sm:$0x3]  ;;  %339 = vst.msk [vmem:[#allocation2 + $0x2] sm:$0x3] %vm240_vm0, %v327_v5 }
 0x115   : > { %v312_v9 = vld [vmem:[#allocation2 + $0x14] sm:$0x3]  ;;  %v313_v16 = vld [vmem:[#allocation2 + $0x16] sm:$0x3]  ;;  %340 = vst.msk [vmem:[#allocation2 + $0x4] sm:$0x3] %vm240_vm0, %v328_v6  ;;  %v334_v31 = vadd.f32 %v322_v14, %v310_v23  ;;  %v335_v22 = vadd.f32 %v323_v18, %v311_v29 }
 0x116   : > { %341 = vst.msk [vmem:[#allocation2 + $0x6] sm:$0x3] %vm240_vm0, %v329_v3  ;;  %342 = vst.msk [vmem:[#allocation2 + $0x8] sm:$0x3] %vm240_vm0, %v330_v25  ;;  %v336_v28 = vadd.f32 %v324_v20, %v312_v9  ;;  %v337_v33 = vadd.f32 %v325_v24, %v313_v16  ;;  %353 = sbr.rel (%p607_p12) target bundleno = 335 (0x14f), region = 48 }
 0x117   : > { %343 = vst.msk [vmem:[#allocation2 + $0xa] sm:$0x3] %vm240_vm0, %v331_v7  ;;  %344 = vst.msk [vmem:[#allocation2 + $0xc] sm:$0x3] %vm240_vm0, %v332_v10 }
 0x118   : > { %345 = vst.msk [vmem:[#allocation2 + $0xe] sm:$0x3] %vm240_vm0, %v333_v27  ;;  %346 = vst.msk [vmem:[#allocation2 + $0x10] sm:$0x3] %vm240_vm0, %v334_v31 }
 0x119   : > { %347 = vst.msk [vmem:[#allocation2 + $0x12] sm:$0x3] %vm240_vm0, %v335_v22  ;;  %348 = vst.msk [vmem:[#allocation2 + $0x14] sm:$0x3] %vm240_vm0, %v336_v28 }
 0x11a   : > { %349 = vst.msk [vmem:[#allocation2 + $0x16] sm:$0x3] %vm240_vm0, %v337_v33 }
 0x11b   : > { %v354_v26 = vld [vmem:[#allocation2] sm:$0x3]  ;;  %v355_v30 = vld [vmem:[#allocation2 + $0x2] sm:$0x3]  ;;  %v367_v37 = vstv %s608_s25  ;;  %v381_v41 = vstv %s609_s27  ;;  %vm514_vm9 = vcmask 253952  }
 0x11c   : > { %v356_v32 = vld [vmem:[#allocation2 + $0x4] sm:$0x3]  ;;  %v368_v38 = vmul.f32 %v367_v37, %v354_v26  ;;  %v369_v39 = vmul.f32 %v367_v37, %v355_v30 }
 0x11d   : > { %v357_v34 = vld [vmem:[#allocation2 + $0x6] sm:$0x3]  ;;  %v358_v35 = vld [vmem:[#allocation2 + $0x8] sm:$0x3]  ;;  %v370_v40 = vmul.f32 %v367_v37, %v356_v32 }
 0x11e   : > { %v359_v36 = vld [vmem:[#allocation2 + $0xa] sm:$0x3]  ;;  %v360_v42 = vld [vmem:[#allocation2 + $0xc] sm:$0x3]  ;;  %v371_v43 = vmul.f32 %v367_v37, %v357_v34  ;;  %v372_v44 = vmul.f32 %v367_v37, %v358_v35  ;;  %v1087_v47 = vadd.f32 %v381_v41, %v368_v38  ;;  %v1089_v48 = vadd.f32 %v381_v41, %v369_v39 }
 0x11f   : > { %v373_v45 = vmul.f32 %v367_v37, %v359_v36  ;;  %v361_v46 = vld [vmem:[#allocation2 + $0xe] sm:$0x3]  ;;  %v1091_v49 = vadd.f32 %v381_v41, %v370_v40  ;;  %v362_v50 = vld [vmem:[#allocation2 + $0x10] sm:$0x3]  ;;  %v374_v54 = vmul.f32 %v367_v37, %v360_v42 }
 0x120   : > { %v1093_v51 = vadd.f32 %v381_v41, %v371_v43  ;;  %v1095_v52 = vadd.f32 %v381_v41, %v372_v44  ;;  %v406_v55 = vmin.f32 %v1087_v47, 0.0  ;;  %v375_v56 = vmul.f32 %v367_v37, %v361_v46  ;;  %v363_v0 = vld [vmem:[#allocation2 + $0x12] sm:$0x3]  ;;  %v364_v2 = vld [vmem:[#allocation2 + $0x14] sm:$0x3] }
 0x121   : > { %v1097_v53 = vadd.f32 %v381_v41, %v373_v45  ;;  %v407_v57 = vmin.f32 %v1089_v48, 0.0  ;;  %v408_v58 = vmin.f32 %v1091_v49, 0.0  ;;  %v376_v59 = vmul.f32 %v367_v37, %v362_v50  ;;  %v365_v3 = vld [vmem:[#allocation2 + $0x16] sm:$0x3] }
 0x122   : > { %v418_v60 = vmul.f32 1.442695, %v406_v55  ;;  %v409_v61 = vmin.f32 %v1093_v51, 0.0  ;;  %v410_v62 = vmin.f32 %v1095_v52, 0.0  ;;  %v1105_v13 = vadd.f32 %v381_v41, %v374_v54 }
 0x123   : > { %v420_v63 = vmul.f32 1.442695, %v407_v57  ;;  %v422_v11 = vmul.f32 1.442695, %v408_v58  ;;  %v411_v12 = vmin.f32 %v1097_v53, 0.0  ;;  %v1107_v19 = vadd.f32 %v381_v41, %v375_v56 }
 0x124   : > { %701 = vpow2.f32 %v418_v60  ;;  %v424_v15 = vmul.f32 1.442695, %v409_v61  ;;  %v426_v17 = vmul.f32 1.442695, %v410_v62  ;;  %v1109_v4 = vadd.f32 %v381_v41, %v376_v59 }
 0x125   : > { %703 = vpow2.f32 %v420_v63  ;;  %v428_v1 = vmul.f32 1.442695, %v411_v12  ;;  %v412_v5 = vmin.f32 %v1105_v13, 0.0  ;;  %v413_v6 = vmin.f32 %v1107_v19, 0.0 }
 0x126   : > { %705 = vpow2.f32 %v422_v11  ;;  %v414_v8 = vmin.f32 %v1109_v4, 0.0  ;;  %v377_v21 = vmul.f32 %v367_v37, %v363_v0  ;;  %v378_v7 = vmul.f32 %v367_v37, %v364_v2 }
 0x127   : > { %707 = vpow2.f32 %v424_v15  ;;  %v430_v23 = vmul.f32 1.442695, %v412_v5  ;;  %v432_v25 = vmul.f32 1.442695, %v413_v6  ;;  %v379_v27 = vmul.f32 %v367_v37, %v365_v3 }
 0x128   : > { %709 = vpow2.f32 %v426_v17  ;;  %v434_v10 = vmul.f32 1.442695, %v414_v8  ;;  %v1114_v29 = vadd.f32 %v381_v41, %v377_v21  ;;  %v1116_v9 = vadd.f32 %v381_v41, %v378_v7 }
 0x129   : > { %711 = vpow2.f32 %v428_v1  ;;  %v1118_v16 = vadd.f32 %v381_v41, %v379_v27  ;;  %vm394_vm1 = vcmp.gt.f32.partialorder %v1087_v47, 0.0  ;;  %vm395_vm2 = vcmp.gt.f32.partialorder %v1089_v48, 0.0 }
 0x12a   : > { %713 = vpow2.f32 %v430_v23  ;;  %v415_v14 = vmin.f32 %v1114_v29, 0.0  ;;  %v416_v18 = vmin.f32 %v1116_v9, 0.0  ;;  %vm396_vm3 = vcmp.gt.f32.partialorder %v1091_v49, 0.0 }
 0x12b   : > { %715 = vpow2.f32 %v432_v25  ;;  %v417_v20 = vmin.f32 %v1118_v16, 0.0  ;;  %vm397_vm4 = vcmp.gt.f32.partialorder %v1093_v51, 0.0  ;;  %vm398_vm5 = vcmp.gt.f32.partialorder %v1095_v52, 0.0 }
 0x12c   : > { %717 = vpow2.f32 %v434_v10  ;;  %v436_v24 = vmul.f32 1.442695, %v415_v14  ;;  %v438_v31 = vmul.f32 1.442695, %v416_v18  ;;  %vm399_vm6 = vcmp.gt.f32.partialorder %v1097_v53, 0.0 }
 0x12d   : > { %v440_v22 = vmul.f32 1.442695, %v417_v20  ;;  %vm400_vm7 = vcmp.gt.f32.partialorder %v1105_v13, 0.0  ;;  %vm401_vm8 = vcmp.gt.f32.partialorder %v1107_v19, 0.0  ;;  %vm402_vm10 = vcmp.gt.f32.partialorder %v1109_v4, 0.0 }
 0x12e   : > { %719 = vpow2.f32 %v436_v24  ;;  %vm403_vm11 = vcmp.gt.f32.partialorder %v1114_v29, 0.0  ;;  %vm404_vm12 = vcmp.gt.f32.partialorder %v1116_v9, 0.0  ;;  %vm405_vm13 = vcmp.gt.f32.partialorder %v1118_v16, 0.0 }
 0x12f   : > { %721 = vpow2.f32 %v438_v31 }
 0x130   : > { %723 = vpow2.f32 %v440_v22 }
 0x131   : > { %v702_v28 = vpop.eup %701 }
 0x132   : > { %v704_v33 = vpop.eup %703  ;;  %v610_v26 = vadd.f32 -1.0, %v702_v28 }
 0x133   : > { %v706_v30 = vpop.eup %705  ;;  %v611_v32 = vadd.f32 -1.0, %v704_v33 }
 0x134   : > { %v708_v34 = vpop.eup %707  ;;  %v612_v35 = vadd.f32 -1.0, %v706_v30  ;;  %v454_v36 = vmul.f32 1.6732632, %v610_v26 }
 0x135   : > { %v710_v37 = vpop.eup %709  ;;  %v455_v38 = vmul.f32 1.6732632, %v611_v32  ;;  %v613_v39 = vadd.f32 -1.0, %v708_v34 }
 0x136   : > { %v712_v40 = vpop.eup %711  ;;  %v456_v41 = vmul.f32 1.6732632, %v612_v35  ;;  %v466_v42 = vsel %vm394_vm1, %v1087_v47, %v454_v36  ;;  %v614_v43 = vadd.f32 -1.0, %v710_v37 }
 0x137   : > { %v714_v44 = vpop.eup %713  ;;  %v467_v45 = vsel %vm395_vm2, %v1089_v48, %v455_v38  ;;  %v478_v46 = vmul.f32 1.050701, %v466_v42  ;;  %v615_v50 = vadd.f32 -1.0, %v712_v40  ;;  %v457_v54 = vmul.f32 1.6732632, %v613_v39 }
 0x138   : > { %v716_v55 = vpop.eup %715  ;;  %v468_v56 = vsel %vm396_vm3, %v1091_v49, %v456_v41  ;;  %v479_v57 = vmul.f32 1.050701, %v467_v45  ;;  %v458_v58 = vmul.f32 1.6732632, %v614_v43  ;;  %v616_v47 = vadd.f32 -1.0, %v714_v44 }
 0x139   : > { %v718_v59 = vpop.eup %717  ;;  %v480_v60 = vmul.f32 1.050701, %v468_v56  ;;  %v490_v61 = vsel %vm240_vm0, %v478_v46, -inf  ;;  %v459_v62 = vmul.f32 1.6732632, %v615_v50  ;;  %v469_v48 = vsel %vm397_vm4, %v1093_v51, %v457_v54 }
 0x13a   : > { %v491_v63 = vsel %vm240_vm0, %v479_v57, -inf  ;;  %v470_v49 = vsel %vm398_vm5, %v1095_v52, %v458_v58  ;;  %v481_v11 = vmul.f32 1.050701, %v469_v48  ;;  %v617_v12 = vadd.f32 -1.0, %v716_v55 }
 0x13b   : > { %v492_v15 = vmax.f32 %v490_v61, %v491_v63  ;;  %v493_v17 = vsel %vm240_vm0, %v480_v60, -inf  ;;  %v471_v0 = vsel %vm399_vm6, %v1097_v53, %v459_v62  ;;  %v482_v1 = vmul.f32 1.050701, %v470_v49  ;;  %v720_v2 = vpop.eup %719 }
 0x13c   : > { %v483_v51 = vmul.f32 1.050701, %v471_v0  ;;  %v495_v5 = vsel %vm240_vm0, %v481_v11, -inf  ;;  %v618_v6 = vadd.f32 -1.0, %v718_v59  ;;  %v460_v3 = vmul.f32 1.6732632, %v616_v47  ;;  %v722_v8 = vpop.eup %721 }
 0x13d   : > { %v494_v21 = vmax.f32 %v492_v15, %v493_v17  ;;  %v496_v52 = vsel %vm240_vm0, %v482_v1, -inf  ;;  %v461_v23 = vmul.f32 1.6732632, %v617_v12  ;;  %v619_v25 = vadd.f32 -1.0, %v720_v2  ;;  %v724_v7 = vpop.eup %723 }
 0x13e   : > { %v497_v10 = vmax.f32 %v495_v5, %v496_v52  ;;  %v498_v27 = vsel %vm240_vm0, %v483_v51, -inf  ;;  %v462_v14 = vmul.f32 1.6732632, %v618_v6  ;;  %v472_v53 = vsel %vm400_vm7, %v1105_v13, %v460_v3 }
 0x13f   : > { %v510_v18 = vpack.c.bf16 %v494_v21, %v494_v21  ;;  %v473_v20 = vsel %vm401_vm8, %v1107_v19, %v461_v23  ;;  %v484_v24 = vmul.f32 1.050701, %v472_v53  ;;  %v620_v31 = vadd.f32 -1.0, %v722_v8 }
 0x140   : > { %v499_v22 = vmax.f32 %v497_v10, %v498_v27  ;;  %v474_v28 = vsel %vm402_vm10, %v1109_v4, %v462_v14  ;;  %v485_v33 = vmul.f32 1.050701, %v473_v20  ;;  %v621_v26 = vadd.f32 -1.0, %v724_v7 }
 0x141   : > { %515 = vst.msk [vmem:[%s1218_s3] sm:$0x1] %vm514_vm9, %v510_v18  ;;  %v486_v13 = vmul.f32 1.050701, %v474_v28  ;;  %v500_v30 = vsel %vm240_vm0, %v484_v24, -inf }
 0x142   : > { %v463_v19 = vmul.f32 1.6732632, %v619_v25  ;;  %v511_v32 = vpack.c.bf16 %v499_v22, %v499_v22  ;;  %v501_v34 = vsel %vm240_vm0, %v485_v33, -inf  ;;  %v464_v35 = vmul.f32 1.6732632, %v620_v31 }
 0x143   : > { %v465_v36 = vmul.f32 1.6732632, %v621_v26  ;;  %v502_v37 = vmax.f32 %v500_v30, %v501_v34  ;;  %v503_v4 = vsel %vm240_vm0, %v486_v13, -inf }
 0x144   : > { %v475_v38 = vsel %vm403_vm11, %v1114_v29, %v463_v19  ;;  %516 = vst.msk [vmem:[%s1218_s3 + $0x1] sm:$0x1] %vm514_vm9, %v511_v32  ;;  %v476_v39 = vsel %vm404_vm12, %v1116_v9, %v464_v35 }
 0x145   : > { %v477_v40 = vsel %vm405_vm13, %v1118_v16, %v465_v36  ;;  %v487_v41 = vmul.f32 1.050701, %v475_v38  ;;  %v504_v42 = vmax.f32 %v502_v37, %v503_v4  ;;  %v488_v43 = vmul.f32 1.050701, %v476_v39 }
 0x146   : > { %v489_v44 = vmul.f32 1.050701, %v477_v40 }
 0x147   : > { %v505_v45 = vsel %vm240_vm0, %v487_v41, -inf  ;;  %v512_v46 = vpack.c.bf16 %v504_v42, %v504_v42  ;;  %v506_v29 = vsel %vm240_vm0, %v488_v43, -inf }
 0x148   : > { %v508_v50 = vsel %vm240_vm0, %v489_v44, -inf  ;;  %v507_v54 = vmax.f32 %v505_v45, %v506_v29 }
 0x149   : > { %517 = vst.msk [vmem:[%s1218_s3 + $0x2] sm:$0x1] %vm514_vm9, %v512_v46 }
 0x14a   : > { %v509_v9 = vmax.f32 %v507_v54, %v508_v50 }
 0x14c   : > { %v513_v55 = vpack.c.bf16 %v509_v9, %v509_v9 }
 0x14e   : > { %518 = vst.msk [vmem:[%s1218_s3 + $0x3] sm:$0x1] %vm514_vm9, %v513_v55 }
 0x14f PF: > { %s17_s17 = sadd.s32 1, %s822_s17   ;;  %s1228_s12 = smov %s806_s13 }
 0x150   : > { %p14_p4 = scmp.ge.s32.totalorder %s17_s17, 6   ;;  %s1229_s13 = smov %s810_s14 }
 0x151   : > { %s1230_s14 = smov %s934_s4  ;;  %s1231_s15 = smov %s818_s16 }
 0x152   : > { %s1232_s16 = smov %s1234_s30  ;;  %16 = sbr.rel (!%p14_p4) target bundleno = 5 (0x5), region = 85 }
 0x157   :  { %536 = vsyncpa [#allocation4], 1 }
 0x158   :  { %538 = vsyncpa [#allocation4 + $0x1], 1 }
 0x159   :  { %539 = vsyncpa [#allocation5], 1 }
 0x15a   :  { %541 = vsyncpa [#allocation5 + $0x1], 1 }

// kernel: model_forward.3
= control target key start
LH: loop header
LB: loop body
LE: loop exit
PB: predicated region body
PF: predicated region fallthrough
CT: control target
= control target key end

     0   :  { %v370_v1 = vmov 0.0   ;;  %vm371_vm0 = vmmov 0   ;;  %vm26_vm1 = vcmask 123904   ;;  %s450_s0 = inlined_call_operand.vmem [shape: bf16[2,128], index: 0, kind: input, shape index: {}]   ;;  %s451_s1 = inlined_call_operand.vmem [shape: bf16[128,16], index: 1, kind: input, shape index: {}]   ;;  %s452_s2 = inlined_call_operand.vmem [shape: f32[1,16], index: 2, kind: input, shape index: {}]   ;;  %s453_s3 = inlined_call_operand.vmem [shape: f32[16,2], index: 3, kind: input, shape index: {}]   ;;  %s454_s4 = inlined_call_operand.vmem [shape: f32[1,2], index: 4, kind: input, shape index: {}]   ;;  %s455_s5 = inlined_call_operand.hbm [shape: f32[2,2], index: 5, kind: output, shape index: {}]  }
   0x1   :  { %v332_v0 = vld [vmem:[%s451_s1 + $0x38] sm:$0xff]   ;;  %302 = vmatprep.subr.bf16.mxu0 %v370_v1  ;;  %322 = vmatprep.subr.mxu1 %v370_v1  ;;  %v333_v2 = vld [vmem:[%s451_s1 + $0x30] sm:$0xff]   ;;  %27 = vst.msk [vmem:[#allocation2] sm:$0x3] %vm26_vm1, %v370_v1  ;;  %v334_v3 = vld [vmem:[%s451_s1 + $0x28] sm:$0xff]  }
   0x2   :  { %303 = vmatpush3.bf16.msra.mxu0 %v332_v0  ;;  %318 = vmatprep.mubr.msk.bf16.mxu0 %vm371_vm0, %v370_v1 }
   0x3   :  { %304 = vmatprep.subr.bf16.mxu0 %v370_v1  ;;  %326 = vmatprep.mubr.msk.f32.mxu1 %vm371_vm0, %v370_v1 }
   0x6   :  { %305 = vmatpush3.bf16.msra.mxu0 %v333_v2 }
   0x7   :  { %306 = vmatprep.subr.bf16.mxu0 %v370_v1 }
   0x8   :  { %10 = vsyncpa [#allocation4], 0  ;;  %v335_v4 = vld [vmem:[%s451_s1 + $0x20] sm:$0xff]   ;;  %v336_v5 = vld [vmem:[%s451_s1 + $0x18] sm:$0xff]   ;;  %vm166_vm3 = vcmask 130048   ;;  %vm248_vm5 = vcmask 9216  }
   0x9   :  { %v337_v6 = vld [vmem:[%s451_s1 + $0x10] sm:$0xff]   ;;  %v338_v7 = vld [vmem:[%s451_s1 + $0x8] sm:$0xff]   ;;  %v339_v8 = vld [vmem:[%s451_s1] sm:$0xff]  }
   0xa   :  { %307 = vmatpush3.bf16.msra.mxu0 %v334_v3  ;;  %v29_v9 = vld [vmem:[%s450_s0] sm:$0x1]  ;;  %v158_v10 = vld [vmem:[%s453_s3 + $0x8] sm:$0xff] }
   0xb   :  { %308 = vmatprep.subr.bf16.mxu0 %v370_v1  ;;  %v157_v11 = vld [vmem:[%s453_s3] sm:$0xff]  ;;  %323 = vmatpush3.msra.mxu1 %v158_v10 }
   0xc   :  { %324 = vmatprep.subr.mxu1 %v370_v1  ;;  %v28_v12 = vld [vmem:[#allocation2] sm:$0x3] }
   0xd   :  { %325 = vmatpush3.msra.mxu1 %v157_v11  ;;  %v285_v18 = vld [vmem:[%s452_s2] ss:$0 sm:$0xff]  ;;  %s372_s2 = smov [#allocation3]  }
   0xe   :  { %309 = vmatpush3.bf16.msra.mxu0 %v335_v4  ;;  %v287_v28 = vld [vmem:[%s454_s4] ss:$0 sm:$0xff]  ;;  %s269_s4 = sshll.u32 %s372_s2, 4  ;;  %s270_s4 = int_to_ptr.vmem [resolvable:$true] %s269_s4 }
   0xf   :  { %310 = vmatprep.subr.bf16.mxu0 %v370_v1  ;;  %s348_s16 = scalar_lea.vmem %s270_s4, 32  ;;  %p353_p1 = scmp.lt.s32.totalorder %s270_s4, %s270_s4 }
  0x10   :  { %p349_p0 = scmp.ne.s32.totalorder %s270_s4, %s348_s16  ;;  %p354_p2 = scmp.lt.s32.totalorder %s348_s16, %s348_s16 }
  0x12   :  { %311 = vmatpush3.bf16.msra.mxu0 %v336_v5  ;;  %p355_p3 = por %p354_p2, %p353_p1 }
  0x13   :  { %312 = vmatprep.subr.bf16.mxu0 %v370_v1 }
  0x14   :  { %p356_p4 = pnand %p355_p3, %p349_p0 }
  0x16   :  { %313 = vmatpush3.bf16.msra.mxu0 %v337_v6 }
  0x17   :  { %314 = vmatprep.subr.bf16.mxu0 %v370_v1 }
  0x1a   :  { %315 = vmatpush3.bf16.msra.mxu0 %v338_v7 }
  0x1b   :  { %316 = vmatprep.subr.bf16.mxu0 %v370_v1 }
  0x1e   :  { %317 = vmatpush3.bf16.msra.mxu0 %v339_v8 }
  0x21   :  { %319 = vmatmul.mubr.bf16.vlgmr.msra.gmra.mxu0 %v29_v9 }
  0xe1   :  { %v128_v13 = vpop.f32.mrf.mxu0 }
  0xe2   :  { %v134_v14 = vadd.f32 %v128_v13, %v28_v12 }
  0xe3   :  { %v320_v15 = vpop.f32.mrf.mxu0 }
  0xe4   :  { %136 = vst.msk [vmem:[#allocation2] sm:$0x3] %vm26_vm1, %v134_v14 }
  0xe5   :  { %v131_v16 = vpop.f32.mrf.mxu0 }
  0xe7   :  { %v321_v17 = vpop.f32.mrf.mxu0 }
  0xeb   :  { %v140_v19 = vld [vmem:[#allocation2] sm:$0x3] }
  0xec   :  { %v148_v20 = vadd.f32 %v285_v18, %v140_v19 }
  0xee   :  { %v150_v21 = vmin.f32 %v148_v20, 0.0  ;;  %vm149_vm2 = vcmp.gt.f32.partialorder %v148_v20, 0.0 }
  0xf0   :  { %v151_v22 = vmul.f32 1.442695, %v150_v21 }
  0xf2   :  { %340 = vpow2.f32 %v151_v22 }
  0xff   :  { %v341_v23 = vpop.eup %340 }
 0x100   :  { %v286_v24 = vadd.f32 -1.0, %v341_v23 }
 0x102   :  { %v154_v25 = vmul.f32 1.6732632, %v286_v24 }
 0x104   :  { %v155_v26 = vsel %vm149_vm2, %v148_v20, %v154_v25 }
 0x105   :  { %v156_v27 = vmul.f32 1.050701, %v155_v26 }
 0x107   :  { %327 = vmatmul.mubr.msk.f32.vlgmr.msra.gmra.mxu1 %vm166_vm3, %v156_v27 }
 0x1c7   :  { %v236_v29 = vpop.f32.mrf.mxu1 }
 0x1c8   :  { %v237_v30 = vadd.f32 %v287_v28, %v236_v29 }
 0x1c9   :  { %v328_v31 = vpop.f32.mrf.mxu1 }
 0x1ca   :  { %v241_v32 = vmin.f32 %v237_v30, 0.0  ;;  %vm240_vm4 = vcmp.gt.f32.partialorder %v237_v30, 0.0 }
 0x1cc   :  { %v242_v33 = vmul.f32 1.442695, %v241_v32 }
 0x1ce   :  { %342 = vpow2.f32 %v242_v33 }
 0x1db   :  { %v343_v34 = vpop.eup %342 }
 0x1dc   :  { %v289_v35 = vadd.f32 -1.0, %v343_v34 }
 0x1de   :  { %v245_v36 = vmul.f32 1.6732632, %v289_v35 }
 0x1e0   :  { %v246_v37 = vsel %vm240_vm4, %v237_v30, %v245_v36 }
 0x1e1   :  { %v247_v38 = vmul.f32 1.050701, %v246_v37 }
 0x1e3   :  { %v249_v39 = vsel %vm248_vm5, %v247_v38, -inf }
 0x1e4   :  { %250 = vmax.xlane.f32.xlu0 %v249_v39 }
 0x26d   :  { %v251_v40 = vpop.xlane.xlu0 %250 }
 0x26e   :  { %v252_v41 = vsub.f32 %v247_v38, %v251_v40 }
 0x270   :  { %v253_v42 = vmul.f32 1.442695, %v252_v41 }
 0x272   :  { %344 = vpow2.f32 %v253_v42 }
 0x27f   :  { %v345_v43 = vpop.eup %344 }
 0x280   :  { %v255_v44 = vsel %vm248_vm5, %v345_v43, 0.0 }
 0x281   :  { %256 = vadd.xlane.f32.xlu0 %v255_v44 }
 0x30a   :  { %v257_v45 = vpop.xlane.xlu0 %256 }
 0x30b   :  { %346 = vlog2.f32 %v257_v45 }
 0x318   :  { %v347_v46 = vpop.eup %346 }
 0x319   :  { %v259_v47 = vmul.f32 0.6931472, %v347_v46 }
 0x31b   :  { %v260_v48 = vadd.f32 %v259_v47, %v251_v40 }
 0x31d   :  { %v261_v49 = vsub.f32 %v247_v38, %v260_v48 }
 0x31f   :  { %262 = vst.msk [vmem:[#allocation3] sm:$0x3] %vm248_vm5, %v261_v49 }
 0x320   :  { %359 = shalt.err (!%p356_p4)
}
 0x321   :  { %272 = dma.vmem_to_hbm [thread:$0]  %s270_s4, 32, %s455_s5, [#allocation4]  }
 0x322   :  { %368 = dma.done.wait [#allocation4], 32  }
 0x323   :  { %369 = vsyncadd [#allocation4], 4294967264 }
 0x324   :  { %276 = vsyncpa [#allocation4], 1 }

</bundles_post_ra>
